<compile_context>
chip_gen: v7x
topology: tpu7x:2x2x1
jax: 0.10.0
libtpu: 0.0.40
codegen_flags: <defaults>
</compile_context>

<pallas_src>
import jax
import jax.numpy as jnp
from jax.experimental import pallas as pl
from jax.experimental.pallas import tpu as pltpu

HIDDEN_DIM = 32            # hidden_dim
H4 = HIDDEN_DIM // 4       # 8
H8 = HIDDEN_DIM // 8       # 4
NUM_BINS = 10              # num_bins
LN_EPS = 1e-5              # nn.LayerNorm default eps
NUM_AA = 20

HYDRO_RANGE = (-4.5, 4.5)
CHARGE_RANGE = (-2.0, 2.0)
WEIGHT_RANGE = (75.0, 204.0)

TILE_N_MAX = 2048          # tokens per grid step (lane axis); multiple of 128

# Column offsets inside the packed "big" weight buffer [HIDDEN_DIM, WBIG_COLS].
_OFF_A = 0                         # folded aa-embedding branch   [H, 20]
_OFF_B = _OFF_A + NUM_AA           # folded hydropathy branch     [H, H8]
_OFF_C = _OFF_B + H8               # folded charge branch         [H, H8]
_OFF_D = _OFF_C + H8               # folded weight branch         [H, H8]
_OFF_FW2 = _OFF_D + H8             # fusion second Linear (T)     [H, H]
_OFF_BFOLD = _OFF_FW2 + HIDDEN_DIM  # folded bias                 [H, 1]
_OFF_FB2 = _OFF_BFOLD + 1          # fusion second bias (T)       [H, 1]
_OFF_GAMMA = _OFF_FB2 + 1          # LayerNorm gamma (T)          [H, 1]
_OFF_BETA = _OFF_GAMMA + 1         # LayerNorm beta  (T)          [H, 1]
WBIG_COLS = _OFF_BETA + 1          # = 68 for HIDDEN_DIM=32
WSM_COLS = 6                       # [w1_hyd, w1_chg, w1_wt, b1_hyd, b1_chg, b1_wt]


# ---------------------------------------------------------------------------
# Kernel helpers (traced inside the Pallas body)
# ---------------------------------------------------------------------------
def _gelu_exact(x):
    return 0.5 * x * (1.0 + jax.lax.erf(x * (1.0 / jnp.sqrt(2.0).astype(x.dtype))))


def _norm_and_bin(x, lo, hi):
    x = jnp.clip(x, lo, hi)
    xn = (x - lo) / (hi - lo)
    return jnp.floor(xn * NUM_BINS) / NUM_BINS


# ---------------------------------------------------------------------------
# Pallas kernel: embedding + 3 scalar MLPs + (folded) fusion MLP + LayerNorm
# for TILE_N tokens per grid step, tokens on the lane axis.
# ---------------------------------------------------------------------------
def physchem_kernel(x_ref, wbig_ref, wsm_ref, out_ref):
    # x_ref   : [4, TILE_N]        rows = (aa as f32, hydropathy, charge, weight)
    # wbig_ref: [H, WBIG_COLS]     packed / pre-folded weights (offsets above)
    # wsm_ref : [H8, WSM_COLS]     per-branch first-Linear weight & bias columns
    # out_ref : [H, TILE_N]        lane-dense transposed output block
    x = x_ref[...]
    t = x.shape[1]

    aa_f = x[0:1, :]                                        # [1, T]
    hyd = _norm_and_bin(x[1:2, :], *HYDRO_RANGE)            # [1, T]
    chg = _norm_and_bin(x[2:3, :], *CHARGE_RANGE)
    wt = _norm_and_bin(x[3:4, :], *WEIGHT_RANGE)

    # one-hot(aa)^T via iota compare (aa is an exact small integer in f32;
    # +0.5 before the truncating cast keeps the round-trip rounding-safe).
    idx = (aa_f + 0.5).astype(jnp.int32)                    # [1, T]
    iota = jax.lax.broadcasted_iota(jnp.int32, (NUM_AA, t), 0)
    onehot_t = (iota == idx).astype(jnp.float32)            # [20, T]

    # Static slices of the resident packed-weight buffers.
    a_t = wbig_ref[:, _OFF_A:_OFF_A + NUM_AA]               # [H, 20]
    b_t = wbig_ref[:, _OFF_B:_OFF_B + H8]                   # [H, H8]
    c_t = wbig_ref[:, _OFF_C:_OFF_C + H8]
    d_t = wbig_ref[:, _OFF_D:_OFF_D + H8]
    fw2_t = wbig_ref[:, _OFF_FW2:_OFF_FW2 + HIDDEN_DIM]     # [H, H]
    b_fold = wbig_ref[:, _OFF_BFOLD:_OFF_BFOLD + 1]         # [H, 1]
    fb2_t = wbig_ref[:, _OFF_FB2:_OFF_FB2 + 1]
    gamma_t = wbig_ref[:, _OFF_GAMMA:_OFF_GAMMA + 1]
    beta_t = wbig_ref[:, _OFF_BETA:_OFF_BETA + 1]

    w1h = wsm_ref[:, 0:1]
    w1c = wsm_ref[:, 1:2]
    w1w = wsm_ref[:, 2:3]
    b1h = wsm_ref[:, 3:4]
    b1c = wsm_ref[:, 4:5]
    b1w = wsm_ref[:, 5:6]

    # Per-feature tiny MLP first layer (K=1 Linear == broadcast FMA) + GELU.
    gh = _gelu_exact(w1h * hyd + b1h)                       # [H8, T]
    gc = _gelu_exact(w1c * chg + b1c)
    gw = _gelu_exact(w1w * wt + b1w)

    # Folded (branch-second-Linear + concat + fusion first Linear):
    #   h^T = A^T @ onehot^T + B^T @ gh + C^T @ gc + D^T @ gw + b_fold
    h = (jnp.dot(a_t, onehot_t, preferred_element_type=jnp.float32)
         + jnp.dot(b_t, gh, preferred_element_type=jnp.float32)
         + jnp.dot(c_t, gc, preferred_element_type=jnp.float32)
         + jnp.dot(d_t, gw, preferred_element_type=jnp.float32)
         + b_fold)                                          # [H, T]
    h = _gelu_exact(h)
    feat = jnp.dot(fw2_t, h, preferred_element_type=jnp.float32) + fb2_t  # [H, T]

    # LayerNorm over the hidden dim (sublane axis in this layout).
    mean = jnp.mean(feat, axis=0, keepdims=True)            # [1, T]
    var = jnp.mean((feat - mean) ** 2, axis=0, keepdims=True)
    normed = (feat - mean) * jax.lax.rsqrt(var + LN_EPS)
    out_ref[...] = normed * gamma_t + beta_t


# ---------------------------------------------------------------------------
# Parameter construction (deterministic, synthetic)
# ---------------------------------------------------------------------------
def init_params(key, hidden_dim=HIDDEN_DIM):
    h4, h8 = hidden_dim // 4, hidden_dim // 8
    keys = jax.random.split(key, 16)

    def lin(k, din, dout):
        kw, kb = jax.random.split(k)
        w = jax.random.normal(kw, (din, dout), jnp.float32) * 0.2
        b = jax.random.normal(kb, (1, dout), jnp.float32) * 0.05
        return w, b

    p = {}
    p["emb"] = jax.random.normal(keys[0], (NUM_AA, h4), jnp.float32) * 0.2
    for name, (k1, k2) in zip(
            ["hyd", "chg", "wt"],
            [(keys[1], keys[2]), (keys[3], keys[4]), (keys[5], keys[6])]):
        w1, b1 = lin(k1, 1, h8)
        w2, b2 = lin(k2, h8, h4)
        p[name] = (w1, b1, w2, b2)
    fw1, fb1 = lin(keys[7], hidden_dim, hidden_dim)
    fw2, fb2 = lin(keys[8], hidden_dim, hidden_dim)
    p["fusion"] = (fw1, fb1, fw2, fb2)
    p["gamma"] = jnp.ones((1, hidden_dim), jnp.float32)
    p["beta"] = jnp.zeros((1, hidden_dim), jnp.float32)
    return p


# ---------------------------------------------------------------------------
# Trace-time weight folding + packing into two small VMEM-resident buffers
# ---------------------------------------------------------------------------
def _pack_weights(params):
    hp = jax.lax.Precision.HIGHEST
    emb = params["emb"]
    hW1, hb1, hW2, hb2 = params["hyd"]
    cW1, cb1, cW2, cb2 = params["chg"]
    wW1, wb1, wW2, wb2 = params["wt"]
    fW1, fb1, fW2, fb2 = params["fusion"]

    # Fold concat + first fusion Linear into the branches.
    A = jnp.dot(emb, fW1[0:H4, :], precision=hp)                     # [20, H]
    B = jnp.dot(hW2, fW1[H4:2 * H4, :], precision=hp)                # [H8, H]
    C = jnp.dot(cW2, fW1[2 * H4:3 * H4, :], precision=hp)
    D = jnp.dot(wW2, fW1[3 * H4:4 * H4, :], precision=hp)
    b_fold = (fb1
              + jnp.dot(hb2, fW1[H4:2 * H4, :], precision=hp)
              + jnp.dot(cb2, fW1[2 * H4:3 * H4, :], precision=hp)
              + jnp.dot(wb2, fW1[3 * H4:4 * H4, :], precision=hp))   # [1, H]

    wbig = jnp.concatenate(
        [A.T, B.T, C.T, D.T, fW2.T,
         b_fold.T, fb2.T, params["gamma"].T, params["beta"].T],
        axis=1).astype(jnp.float32)                                  # [H, 68]

    wsm = jnp.concatenate(
        [hW1.T, cW1.T, wW1.T, hb1.T, cb1.T, wb1.T],
        axis=1).astype(jnp.float32)                                  # [H8, 6]
    return wbig, wsm


# ---------------------------------------------------------------------------
# Wrapper: pack tokens, invoke tiled/pipelined pallas_call, un-transpose
# ---------------------------------------------------------------------------
def _round_up(x, m):
    return (x + m - 1) // m * m


@jax.jit
def physchem_encoder(params, aa_indices, hydropathy, charge, weight):
    b, s = aa_indices.shape
    n = b * s
    h = HIDDEN_DIM

    # Tile the token (lane) axis; keep it 128-lane aligned so tiled blocks
    # satisfy the (8, 128) constraint.
    tile_n = min(TILE_N_MAX, _round_up(n, 128))
    n_pad = _round_up(n, tile_n)

    # Pack the four per-token features into one [4, N_pad] slab
    # (one contiguous DMA stream instead of four lane-sparse [N,1] refs).
    x = jnp.stack([aa_indices.reshape(n).astype(jnp.float32),
                   hydropathy.reshape(n).astype(jnp.float32),
                   charge.reshape(n).astype(jnp.float32),
                   weight.reshape(n).astype(jnp.float32)], axis=0)   # [4, n]
    x = jnp.pad(x, ((0, 0), (0, n_pad - n)))

    wbig, wsm = _pack_weights(params)

    out_t = pl.pallas_call(
        physchem_kernel,
        out_shape=jax.ShapeDtypeStruct((h, n_pad), jnp.float32),
        grid_spec=pltpu.PrefetchScalarGridSpec(
            num_scalar_prefetch=0,
            grid=(n_pad // tile_n,),
            in_specs=[
                pl.BlockSpec((4, tile_n), lambda i: (0, i)),
                pl.BlockSpec((h, WBIG_COLS), lambda i: (0, 0)),    # resident
                pl.BlockSpec((H8, WSM_COLS), lambda i: (0, 0)),    # resident
            ],
            out_specs=pl.BlockSpec((h, tile_n), lambda i: (0, i)),
        ),
        compiler_params=pltpu.CompilerParams(
            # Token axis is embarrassingly parallel -> shard across the
            # two TensorCores on v7x (no-op on v5e/v6e).
            dimension_semantics=("parallel",),
        ),
    )(x, wbig, wsm)

    # Lane-dense [H, N_pad] slab -> [b, s, H] (wrapper-side layout plumbing).
    return out_t[:, :n].T.reshape(b, s, h)


# ---------------------------------------------------------------------------
# Pure-JAX reference (mirrors the PyTorch forward, eval mode)
# ---------------------------------------------------------------------------
def reference(params, aa_indices, hydropathy, charge, weight):
    b, s = aa_indices.shape
    n = b * s
    aa = aa_indices.reshape(n).astype(jnp.int32)
    hyd = hydropathy.reshape(n, 1)
    chg = charge.reshape(n, 1)
    wt = weight.reshape(n, 1)

    hp = jax.lax.Precision.HIGHEST

    def gelu(x):
        return 0.5 * x * (1.0 + jax.lax.erf(x / jnp.sqrt(2.0)))

    def nb(x, lo, hi):
        x = jnp.clip(x, lo, hi)
        xn = (x - lo) / (hi - lo)
        return jnp.floor(xn * NUM_BINS) / NUM_BINS

    def enc(x, p):
        w1, b1, w2, b2 = p
        hdn = gelu(x @ w1 + b1)
        return jnp.dot(hdn, w2, precision=hp) + b2

    aa_emb = params["emb"][aa]
    hyd_e = enc(nb(hyd, *HYDRO_RANGE), params["hyd"])
    chg_e = enc(nb(chg, *CHARGE_RANGE), params["chg"])
    wt_e = enc(nb(wt, *WEIGHT_RANGE), params["wt"])
    combined = jnp.concatenate([aa_emb, hyd_e, chg_e, wt_e], axis=-1)

    fW1, fb1, fW2, fb2 = params["fusion"]
    hdn = gelu(jnp.dot(combined, fW1, precision=hp) + fb1)
    feat = jnp.dot(hdn, fW2, precision=hp) + fb2

    mean = jnp.mean(feat, axis=-1, keepdims=True)
    var = jnp.mean((feat - mean) ** 2, axis=-1, keepdims=True)
    feat = (feat - mean) / jnp.sqrt(var + LN_EPS)
    feat = feat * params["gamma"] + params["beta"]
    return feat.reshape(b, s, HIDDEN_DIM)


if __name__ == "__main__":
    B, S = 2, 8
    key = jax.random.PRNGKey(0)
    kp, k1, k2, k3, k4 = jax.random.split(key, 5)

    params = init_params(kp)
    aa_indices = jax.random.randint(k1, (B, S), 0, NUM_AA, dtype=jnp.int32)
    hydropathy = jax.random.uniform(k2, (B, S, 1), jnp.float32, -5.0, 5.0)
    charge = jax.random.uniform(k3, (B, S, 1), jnp.float32, -3.0, 3.0)
    weight = jax.random.uniform(k4, (B, S, 1), jnp.float32, 70.0, 210.0)

    out = physchem_encoder(params, aa_indices, hydropathy, charge, weight)
    out = jax.block_until_ready(out)

    ref = reference(params, aa_indices, hydropathy, charge, weight)
    assert out.shape == (B, S, HIDDEN_DIM)
    assert jnp.allclose(out, ref, atol=1e-3, rtol=1e-3), float(jnp.max(jnp.abs(out - ref)))

    print("KERNEL_OK")
</pallas_src>

<mosaic_0001>
module attributes {stable_mosaic.version = 11 : i64} {
  func.func @physchem_kernel(%arg0: i32, %arg1: memref<4x128xf32, #tpu.memory_space<vmem>>, %arg2: memref<32x68xf32, #tpu.memory_space<vmem>>, %arg3: memref<4x6xf32, #tpu.memory_space<vmem>>, %arg4: memref<32x128xf32, #tpu.memory_space<vmem>>) attributes {dimension_semantics = [#tpu.dimension_semantics<parallel>], iteration_bounds = array<i64: 1>, scalar_prefetch = 0 : i64, scratch_operands = 0 : i64, tpu.core_type = #tpu.core_type<tc>, window_params = [{transform_indices = @transform_0, window_bounds = array<i64: 4, 128>}, {pipeline_mode = #tpu.pipeline_mode<synchronous>, transform_indices = @transform_1, window_bounds = array<i64: 32, 68>}, {pipeline_mode = #tpu.pipeline_mode<synchronous>, transform_indices = @transform_2, window_bounds = array<i64: 4, 6>}, {transform_indices = @transform_3, window_bounds = array<i64: 32, 128>}]} {
    %c0 = arith.constant 0 : index
    %c0_0 = arith.constant 0 : index
    %0 = vector.load %arg1[%c0, %c0_0] : memref<4x128xf32, #tpu.memory_space<vmem>>, vector<4x128xf32>
    %1 = vector.extract_strided_slice %0 {offsets = [0, 0], sizes = [1, 128], strides = [1, 1]} : vector<4x128xf32> to vector<1x128xf32>
    %2 = vector.extract_strided_slice %0 {offsets = [1, 0], sizes = [1, 128], strides = [1, 1]} : vector<4x128xf32> to vector<1x128xf32>
    %cst = arith.constant -4.500000e+00 : f32
    %cst_1 = arith.constant 4.500000e+00 : f32
    %3 = vector.broadcast %cst : f32 to vector<1x128xf32>
    %4 = arith.maximumf %3, %2 : vector<1x128xf32>
    %5 = vector.broadcast %cst_1 : f32 to vector<1x128xf32>
    %6 = arith.minimumf %5, %4 : vector<1x128xf32>
    %cst_2 = arith.constant -4.500000e+00 : f32
    %7 = vector.broadcast %cst_2 : f32 to vector<1x128xf32>
    %8 = arith.subf %6, %7 : vector<1x128xf32>
    %cst_3 = arith.constant 9.000000e+00 : f32
    %9 = vector.broadcast %cst_3 : f32 to vector<1x128xf32>
    %10 = arith.divf %8, %9 : vector<1x128xf32>
    %cst_4 = arith.constant 1.000000e+01 : f32
    %11 = vector.broadcast %cst_4 : f32 to vector<1x128xf32>
    %12 = arith.mulf %10, %11 : vector<1x128xf32>
    %13 = math.floor %12 : vector<1x128xf32>
    %cst_5 = arith.constant 1.000000e+01 : f32
    %14 = vector.broadcast %cst_5 : f32 to vector<1x128xf32>
    %15 = arith.divf %13, %14 : vector<1x128xf32>
    %16 = vector.extract_strided_slice %0 {offsets = [2, 0], sizes = [1, 128], strides = [1, 1]} : vector<4x128xf32> to vector<1x128xf32>
    %cst_6 = arith.constant -2.000000e+00 : f32
    %cst_7 = arith.constant 2.000000e+00 : f32
    %17 = vector.broadcast %cst_6 : f32 to vector<1x128xf32>
    %18 = arith.maximumf %17, %16 : vector<1x128xf32>
    %19 = vector.broadcast %cst_7 : f32 to vector<1x128xf32>
    %20 = arith.minimumf %19, %18 : vector<1x128xf32>
    %cst_8 = arith.constant -2.000000e+00 : f32
    %21 = vector.broadcast %cst_8 : f32 to vector<1x128xf32>
    %22 = arith.subf %20, %21 : vector<1x128xf32>
    %cst_9 = arith.constant 4.000000e+00 : f32
    %23 = vector.broadcast %cst_9 : f32 to vector<1x128xf32>
    %24 = arith.divf %22, %23 : vector<1x128xf32>
    %cst_10 = arith.constant 1.000000e+01 : f32
    %25 = vector.broadcast %cst_10 : f32 to vector<1x128xf32>
    %26 = arith.mulf %24, %25 : vector<1x128xf32>
    %27 = math.floor %26 : vector<1x128xf32>
    %cst_11 = arith.constant 1.000000e+01 : f32
    %28 = vector.broadcast %cst_11 : f32 to vector<1x128xf32>
    %29 = arith.divf %27, %28 : vector<1x128xf32>
    %30 = vector.extract_strided_slice %0 {offsets = [3, 0], sizes = [1, 128], strides = [1, 1]} : vector<4x128xf32> to vector<1x128xf32>
    %cst_12 = arith.constant 7.500000e+01 : f32
    %cst_13 = arith.constant 2.040000e+02 : f32
    %31 = vector.broadcast %cst_12 : f32 to vector<1x128xf32>
    %32 = arith.maximumf %31, %30 : vector<1x128xf32>
    %33 = vector.broadcast %cst_13 : f32 to vector<1x128xf32>
    %34 = arith.minimumf %33, %32 : vector<1x128xf32>
    %cst_14 = arith.constant 7.500000e+01 : f32
    %35 = vector.broadcast %cst_14 : f32 to vector<1x128xf32>
    %36 = arith.subf %34, %35 : vector<1x128xf32>
    %cst_15 = arith.constant 1.290000e+02 : f32
    %37 = vector.broadcast %cst_15 : f32 to vector<1x128xf32>
    %38 = arith.divf %36, %37 : vector<1x128xf32>
    %cst_16 = arith.constant 1.000000e+01 : f32
    %39 = vector.broadcast %cst_16 : f32 to vector<1x128xf32>
    %40 = arith.mulf %38, %39 : vector<1x128xf32>
    %41 = math.floor %40 : vector<1x128xf32>
    %cst_17 = arith.constant 1.000000e+01 : f32
    %42 = vector.broadcast %cst_17 : f32 to vector<1x128xf32>
    %43 = arith.divf %41, %42 : vector<1x128xf32>
    %cst_18 = arith.constant 5.000000e-01 : f32
    %44 = vector.broadcast %cst_18 : f32 to vector<1x128xf32>
    %45 = arith.addf %1, %44 : vector<1x128xf32>
    %46 = arith.fptosi %45 : vector<1x128xf32> to vector<1x128xi32>
    %47 = tpu.iota {dimensions = array<i32: 0>} : vector<20x128xi32>
    %48 = vector.broadcast %46 : vector<1x128xi32> to vector<20x128xi32>
    %49 = arith.cmpi eq, %47, %48 : vector<20x128xi32>
    %50 = arith.extui %49 : vector<20x128xi1> to vector<20x128xi32>
    %51 = arith.sitofp %50 : vector<20x128xi32> to vector<20x128xf32>
    %c0_19 = arith.constant 0 : index
    %c0_20 = arith.constant 0 : index
    %52 = vector.load %arg2[%c0_19, %c0_20] : memref<32x68xf32, #tpu.memory_space<vmem>>, vector<32x20xf32>
    %c0_21 = arith.constant 0 : index
    %c20 = arith.constant 20 : index
    %53 = vector.load %arg2[%c0_21, %c20] : memref<32x68xf32, #tpu.memory_space<vmem>>, vector<32x4xf32>
    %c0_22 = arith.constant 0 : index
    %c24 = arith.constant 24 : index
    %54 = vector.load %arg2[%c0_22, %c24] : memref<32x68xf32, #tpu.memory_space<vmem>>, vector<32x4xf32>
    %c0_23 = arith.constant 0 : index
    %c28 = arith.constant 28 : index
    %55 = vector.load %arg2[%c0_23, %c28] : memref<32x68xf32, #tpu.memory_space<vmem>>, vector<32x4xf32>
    %c0_24 = arith.constant 0 : index
    %c32 = arith.constant 32 : index
    %56 = vector.load %arg2[%c0_24, %c32] : memref<32x68xf32, #tpu.memory_space<vmem>>, vector<32x32xf32>
    %c0_25 = arith.constant 0 : index
    %c64 = arith.constant 64 : index
    %57 = vector.load %arg2[%c0_25, %c64] : memref<32x68xf32, #tpu.memory_space<vmem>>, vector<32x1xf32>
    %c0_26 = arith.constant 0 : index
    %c65 = arith.constant 65 : index
    %58 = vector.load %arg2[%c0_26, %c65] : memref<32x68xf32, #tpu.memory_space<vmem>>, vector<32x1xf32>
    %c0_27 = arith.constant 0 : index
    %c66 = arith.constant 66 : index
    %59 = vector.load %arg2[%c0_27, %c66] : memref<32x68xf32, #tpu.memory_space<vmem>>, vector<32x1xf32>
    %c0_28 = arith.constant 0 : index
    %c67 = arith.constant 67 : index
    %60 = vector.load %arg2[%c0_28, %c67] : memref<32x68xf32, #tpu.memory_space<vmem>>, vector<32x1xf32>
    %c0_29 = arith.constant 0 : index
    %c0_30 = arith.constant 0 : index
    %61 = vector.load %arg3[%c0_29, %c0_30] : memref<4x6xf32, #tpu.memory_space<vmem>>, vector<4x1xf32>
    %c0_31 = arith.constant 0 : index
    %c1 = arith.constant 1 : index
    %62 = vector.load %arg3[%c0_31, %c1] : memref<4x6xf32, #tpu.memory_space<vmem>>, vector<4x1xf32>
    %c0_32 = arith.constant 0 : index
    %c2 = arith.constant 2 : index
    %63 = vector.load %arg3[%c0_32, %c2] : memref<4x6xf32, #tpu.memory_space<vmem>>, vector<4x1xf32>
    %c0_33 = arith.constant 0 : index
    %c3 = arith.constant 3 : index
    %64 = vector.load %arg3[%c0_33, %c3] : memref<4x6xf32, #tpu.memory_space<vmem>>, vector<4x1xf32>
    %c0_34 = arith.constant 0 : index
    %c4 = arith.constant 4 : index
    %65 = vector.load %arg3[%c0_34, %c4] : memref<4x6xf32, #tpu.memory_space<vmem>>, vector<4x1xf32>
    %c0_35 = arith.constant 0 : index
    %c5 = arith.constant 5 : index
    %66 = vector.load %arg3[%c0_35, %c5] : memref<4x6xf32, #tpu.memory_space<vmem>>, vector<4x1xf32>
    %67 = vector.broadcast %61 : vector<4x1xf32> to vector<4x128xf32>
    %68 = vector.broadcast %15 : vector<1x128xf32> to vector<4x128xf32>
    %69 = arith.mulf %67, %68 : vector<4x128xf32>
    %70 = vector.broadcast %64 : vector<4x1xf32> to vector<4x128xf32>
    %71 = arith.addf %69, %70 : vector<4x128xf32>
    %cst_36 = arith.constant 5.000000e-01 : f32
    %72 = vector.broadcast %cst_36 : f32 to vector<4x128xf32>
    %73 = arith.mulf %72, %71 : vector<4x128xf32>
    %cst_37 = arith.constant 2.000000e+00 : f32
    %74 = math.sqrt %cst_37 : f32
    %cst_38 = arith.constant 1.000000e+00 : f32
    %75 = arith.divf %cst_38, %74 : f32
    %76 = vector.broadcast %75 : f32 to vector<4x128xf32>
    %77 = arith.mulf %71, %76 : vector<4x128xf32>
    %78 = math.erf %77 : vector<4x128xf32>
    %cst_39 = arith.constant 1.000000e+00 : f32
    %79 = vector.broadcast %cst_39 : f32 to vector<4x128xf32>
    %80 = arith.addf %79, %78 : vector<4x128xf32>
    %81 = arith.mulf %73, %80 : vector<4x128xf32>
    %82 = vector.broadcast %62 : vector<4x1xf32> to vector<4x128xf32>
    %83 = vector.broadcast %29 : vector<1x128xf32> to vector<4x128xf32>
    %84 = arith.mulf %82, %83 : vector<4x128xf32>
    %85 = vector.broadcast %65 : vector<4x1xf32> to vector<4x128xf32>
    %86 = arith.addf %84, %85 : vector<4x128xf32>
    %cst_40 = arith.constant 5.000000e-01 : f32
    %87 = vector.broadcast %cst_40 : f32 to vector<4x128xf32>
    %88 = arith.mulf %87, %86 : vector<4x128xf32>
    %cst_41 = arith.constant 2.000000e+00 : f32
    %89 = math.sqrt %cst_41 : f32
    %cst_42 = arith.constant 1.000000e+00 : f32
    %90 = arith.divf %cst_42, %89 : f32
    %91 = vector.broadcast %90 : f32 to vector<4x128xf32>
    %92 = arith.mulf %86, %91 : vector<4x128xf32>
    %93 = math.erf %92 : vector<4x128xf32>
    %cst_43 = arith.constant 1.000000e+00 : f32
    %94 = vector.broadcast %cst_43 : f32 to vector<4x128xf32>
    %95 = arith.addf %94, %93 : vector<4x128xf32>
    %96 = arith.mulf %88, %95 : vector<4x128xf32>
    %97 = vector.broadcast %63 : vector<4x1xf32> to vector<4x128xf32>
    %98 = vector.broadcast %43 : vector<1x128xf32> to vector<4x128xf32>
    %99 = arith.mulf %97, %98 : vector<4x128xf32>
    %100 = vector.broadcast %66 : vector<4x1xf32> to vector<4x128xf32>
    %101 = arith.addf %99, %100 : vector<4x128xf32>
    %cst_44 = arith.constant 5.000000e-01 : f32
    %102 = vector.broadcast %cst_44 : f32 to vector<4x128xf32>
    %103 = arith.mulf %102, %101 : vector<4x128xf32>
    %cst_45 = arith.constant 2.000000e+00 : f32
    %104 = math.sqrt %cst_45 : f32
    %cst_46 = arith.constant 1.000000e+00 : f32
    %105 = arith.divf %cst_46, %104 : f32
    %106 = vector.broadcast %105 : f32 to vector<4x128xf32>
    %107 = arith.mulf %101, %106 : vector<4x128xf32>
    %108 = math.erf %107 : vector<4x128xf32>
    %cst_47 = arith.constant 1.000000e+00 : f32
    %109 = vector.broadcast %cst_47 : f32 to vector<4x128xf32>
    %110 = arith.addf %109, %108 : vector<4x128xf32>
    %111 = arith.mulf %103, %110 : vector<4x128xf32>
    %cst_48 = arith.constant dense<0.000000e+00> : vector<32x128xf32>
    %112 = tpu.matmul %52, %51, %cst_48 {dimension_numbers = #tpu.dot_dimension_numbers<[1], [0], [0], [1], [0, 0, 1, 1], [], []>} : vector<32x20xf32>, vector<20x128xf32>, vector<32x128xf32> -> vector<32x128xf32>
    %cst_49 = arith.constant dense<0.000000e+00> : vector<32x128xf32>
    %113 = tpu.matmul %53, %81, %cst_49 {dimension_numbers = #tpu.dot_dimension_numbers<[1], [0], [0], [1], [0, 0, 1, 1], [], []>} : vector<32x4xf32>, vector<4x128xf32>, vector<32x128xf32> -> vector<32x128xf32>
    %114 = arith.addf %112, %113 : vector<32x128xf32>
    %cst_50 = arith.constant dense<0.000000e+00> : vector<32x128xf32>
    %115 = tpu.matmul %54, %96, %cst_50 {dimension_numbers = #tpu.dot_dimension_numbers<[1], [0], [0], [1], [0, 0, 1, 1], [], []>} : vector<32x4xf32>, vector<4x128xf32>, vector<32x128xf32> -> vector<32x128xf32>
    %116 = arith.addf %114, %115 : vector<32x128xf32>
    %cst_51 = arith.constant dense<0.000000e+00> : vector<32x128xf32>
    %117 = tpu.matmul %55, %111, %cst_51 {dimension_numbers = #tpu.dot_dimension_numbers<[1], [0], [0], [1], [0, 0, 1, 1], [], []>} : vector<32x4xf32>, vector<4x128xf32>, vector<32x128xf32> -> vector<32x128xf32>
    %118 = arith.addf %116, %117 : vector<32x128xf32>
    %119 = vector.broadcast %57 : vector<32x1xf32> to vector<32x128xf32>
    %120 = arith.addf %118, %119 : vector<32x128xf32>
    %cst_52 = arith.constant 5.000000e-01 : f32
    %121 = vector.broadcast %cst_52 : f32 to vector<32x128xf32>
    %122 = arith.mulf %121, %120 : vector<32x128xf32>
    %cst_53 = arith.constant 2.000000e+00 : f32
    %123 = math.sqrt %cst_53 : f32
    %cst_54 = arith.constant 1.000000e+00 : f32
    %124 = arith.divf %cst_54, %123 : f32
    %125 = vector.broadcast %124 : f32 to vector<32x128xf32>
    %126 = arith.mulf %120, %125 : vector<32x128xf32>
    %127 = math.erf %126 : vector<32x128xf32>
    %cst_55 = arith.constant 1.000000e+00 : f32
    %128 = vector.broadcast %cst_55 : f32 to vector<32x128xf32>
    %129 = arith.addf %128, %127 : vector<32x128xf32>
    %130 = arith.mulf %122, %129 : vector<32x128xf32>
    %cst_56 = arith.constant dense<0.000000e+00> : vector<32x128xf32>
    %131 = tpu.matmul %56, %130, %cst_56 {dimension_numbers = #tpu.dot_dimension_numbers<[1], [0], [0], [1], [0, 0, 1, 1], [], []>} : vector<32x32xf32>, vector<32x128xf32>, vector<32x128xf32> -> vector<32x128xf32>
    %132 = vector.broadcast %58 : vector<32x1xf32> to vector<32x128xf32>
    %133 = arith.addf %131, %132 : vector<32x128xf32>
    %cst_57 = arith.constant dense<0.000000e+00> : vector<128xf32>
    %134 = vector.multi_reduction <add>, %133, %cst_57 [0] : vector<32x128xf32> to vector<128xf32>
    %135 = vector.shape_cast %134 : vector<128xf32> to vector<1x128xf32>
    %cst_58 = arith.constant 3.200000e+01 : f32
    %136 = vector.broadcast %cst_58 : f32 to vector<1x128xf32>
    %137 = arith.divf %135, %136 : vector<1x128xf32>
    %138 = vector.broadcast %137 : vector<1x128xf32> to vector<32x128xf32>
    %139 = arith.subf %133, %138 : vector<32x128xf32>
    %140 = arith.mulf %139, %139 : vector<32x128xf32>
    %cst_59 = arith.constant dense<0.000000e+00> : vector<128xf32>
    %141 = vector.multi_reduction <add>, %140, %cst_59 [0] : vector<32x128xf32> to vector<128xf32>
    %142 = vector.shape_cast %141 : vector<128xf32> to vector<1x128xf32>
    %cst_60 = arith.constant 3.200000e+01 : f32
    %143 = vector.broadcast %cst_60 : f32 to vector<1x128xf32>
    %144 = arith.divf %142, %143 : vector<1x128xf32>
    %145 = vector.broadcast %137 : vector<1x128xf32> to vector<32x128xf32>
    %146 = arith.subf %133, %145 : vector<32x128xf32>
    %cst_61 = arith.constant 9.99999974E-6 : f32
    %147 = vector.broadcast %cst_61 : f32 to vector<1x128xf32>
    %148 = arith.addf %144, %147 : vector<1x128xf32>
    %149 = math.rsqrt %148 : vector<1x128xf32>
    %150 = vector.broadcast %149 : vector<1x128xf32> to vector<32x128xf32>
    %151 = arith.mulf %146, %150 : vector<32x128xf32>
    %152 = vector.broadcast %59 : vector<32x1xf32> to vector<32x128xf32>
    %153 = arith.mulf %151, %152 : vector<32x128xf32>
    %154 = vector.broadcast %60 : vector<32x1xf32> to vector<32x128xf32>
    %155 = arith.addf %153, %154 : vector<32x128xf32>
    %c0_62 = arith.constant 0 : index
    %c0_63 = arith.constant 0 : index
    %156 = vector.load %arg4[%c0_62, %c0_63] : memref<32x128xf32, #tpu.memory_space<vmem>>, vector<32x128xf32>
    tpu.vector_store %arg4[%c0_62, %c0_63], %155 {strides = array<i32>} : memref<32x128xf32, #tpu.memory_space<vmem>>, vector<32x128xf32>,
    return
  }
  func.func @transform_0(%arg0: i32) -> (i32, i32) {
    %c0_i32 = arith.constant 0 : i32
    %c0_i32_0 = arith.constant 0 : i32
    return %c0_i32, %arg0 : i32, i32
  }
  func.func @transform_1(%arg0: i32) -> (i32, i32) {
    %c0_i32 = arith.constant 0 : i32
    %c0_i32_0 = arith.constant 0 : i32
    %c0_i32_1 = arith.constant 0 : i32
    return %c0_i32, %c0_i32_0 : i32, i32
  }
  func.func @transform_2(%arg0: i32) -> (i32, i32) {
    %c0_i32 = arith.constant 0 : i32
    %c0_i32_0 = arith.constant 0 : i32
    %c0_i32_1 = arith.constant 0 : i32
    return %c0_i32, %c0_i32_0 : i32, i32
  }
  func.func @transform_3(%arg0: i32) -> (i32, i32) {
    %c0_i32 = arith.constant 0 : i32
    %c0_i32_0 = arith.constant 0 : i32
    return %c0_i32, %arg0 : i32, i32
  }
}

</mosaic_0001>

<bundles_post_ra>
// kernel: physchem_encoder.1
= control target key start
LH: loop header
LB: loop body
LE: loop exit
PB: predicated region body
PF: predicated region fallthrough
CT: control target
= control target key end

     0   :  { %v974_v0 = vmov 1   ;;  %v975_v1 = vmov 0   ;;  %v976_v3 = vmov 4   ;;  %v977_v4 = vmov 3   ;;  %s981_s16 = smov 104   ;;  %s982_s23 = smov 100   ;;  %s1122_s2 = inlined_call_operand.vmem [shape: f32[4,6], index: 2, kind: input, shape index: {}]   ;;  %s1123_s1 = inlined_call_operand.vmem [shape: f32[32,68], index: 1, kind: input, shape index: {}]   ;;  %s1124_s0 = inlined_call_operand.vmem [shape: f32[4,128], index: 0, kind: input, shape index: {}]   ;;  %s1125_s3 = inlined_call_operand.vmem [shape: f32[32,128], index: 3, kind: output, shape index: {}]  }
   0x1   :  { %946 = vset.pattern.permute.xlu1 %v974_v0  ;;  %944 = vset.pattern.permute.xlu0 %v975_v1  ;;  %v63_v2 = vld [vmem:[%s1122_s2] sm:$0xf]  ;;  %v978_v5 = vmov 2   ;;  %v979_v6 = vmov 5   ;;  %s980_s2 = smov 108   ;;  %v1023_v8 = vld [vmem:[%s1123_s1 + $0x8] sm:$0xff]  ;;  %v42_v23 = vlaneseq }
   0x2   :  { %85 = vperm.xlu1 %946, %v63_v2   ;;  %66 = vperm.xlu0 %944, %v63_v2   ;;  %v1016_v7 = vld [vmem:[%s1123_s1] sm:$0xff]  ;;  %v1030_v9 = vld [vmem:[%s1123_s1 + $0x10] sm:$0xff]  ;;  %v1037_v10 = vld [vmem:[%s1123_s1 + $0x18] sm:$0xff]  ;;  %v983_v11 = vmov 64   ;;  %s984_s1 = smov 96   ;;  %vm134_vm0 = vcmask 31744  }
   0x3   :  { %v14_v12 = vld [vmem:[%s1124_s0] sm:$0xf]  ;;  %v43_v27 = vshrl.u32 %v42_v23, 7  ;;  %vm143_vm3 = vcmask 1043456   ;;  %vm232_vm6 = vcmask 162816   ;;  %vm609_vm7 = vcmask 261120  }
   0x4   :  { %v788_v13 = vclamps-f32 %v14_v12, 2.0  ;;  %v786_v14 = vclamps-f32 %v14_v12, 4.5  ;;  %v32_v16 = vmax.f32 %v14_v12, 75.0  ;;  %v40_v47 = vadd.f32 0.5, %v14_v12 }
   0x5   :  { %v90_v29 = vsub.s32 2, %v43_v27  ;;  %v71_v32 = vsub.s32 1, %v43_v27  ;;  %v109_v40 = vsub.s32 3, %v43_v27  ;;  %v48_v59 = vsub.s32 0, %v43_v27 }
   0x6   :  { %947 = vset.pattern.permute.xlu1 %v976_v3  ;;  %945 = vset.pattern.permute.xlu0 %v977_v4  ;;  %v789_v15 = vadd.f32 2.0, %v788_v13  ;;  %v787_v17 = vadd.f32 4.5, %v786_v14  ;;  %v33_v19 = vmin.f32 %v32_v16, 204.0  ;;  %v926_v53 = vtrunc.f32 %v40_v47 }
   0x7   :  { %94 = vperm.xlu1 %947, %v63_v2   ;;  %75 = vperm.xlu0 %945, %v63_v2   ;;  %v44_v62 = vadd.s32 8, %v43_v27  ;;  %v45_v3 = vadd.s32 16, %v43_v27 }
   0x8   :  { %v28_v18 = vmul.f32 0.25, %v789_v15  ;;  %v19_v20 = vmul.f32 0.11111111, %v787_v17  ;;  %v790_v22 = vadd.f32 -75.0, %v33_v19  ;;  %v927_v58 = vcvt.f32.s32 %v926_v53 }
   0xa   :  { %v29_v21 = vmul.f32 10.0, %v28_v18  ;;  %v20_v24 = vmul.f32 10.0, %v19_v20  ;;  %v36_v26 = vmul.f32 0.007751938, %v790_v22  ;;  %v49_v63 = vrot.slane %v927_v58, %v48_v59 }
   0xb   :  { %948 = vset.pattern.permute.xlu1 %v978_v5  ;;  %949 = vset.pattern.permute.xlu0 %v979_v6  ;;  %v986_v22 = vmov 0.0  }
   0xc   :  { %104 = vperm.xlu1 %948, %v63_v2   ;;  %113 = vperm.xlu0 %949, %v63_v2   ;;  %v30_v25 = vfloor.f32 %v29_v21  ;;  %v21_v28 = vfloor.f32 %v20_v24  ;;  %v37_v31 = vmul.f32 10.0, %v36_v26  ;;  %vm50_vm1 = vcmp.eq.s32.totalorder %v43_v27, %v49_v63 }
   0xd   :  { %vm51_vm2 = vcmp.eq.s32.totalorder %v44_v62, %v49_v63  ;;  %vm52_vm5 = vcmp.eq.s32.totalorder %v45_v3, %v49_v63  ;;  %v985_v21 = vmov 1.0|1.0  }
   0xe   :  { %v31_v30 = vmul.f32 0.1, %v30_v25  ;;  %v23_v33 = vmul.f32 0.1, %v21_v28  ;;  %v38_v35 = vfloor.f32 %v37_v31  ;;  %vm1058_vm4 = vmpackc.low %vm51_vm2, %vm50_vm1  ;;  %v793_v23 = vsel %vm52_vm5, 1.0, %v986_v22 }
  0x10   :  { %126 = vrot.lane.b32.xlu1 %v1016_v7, %s980_s2  ;;  %329 = vrot.lane.b32.xlu0 %v1016_v7, %s981_s16  ;;  %v91_v34 = vrot.slane %v31_v30, %v90_v29  ;;  %v72_v38 = vrot.slane %v23_v33, %v71_v32  ;;  %v39_v41 = vmul.f32 0.1, %v38_v35  ;;  %v987_v33 = vmov 65  }
  0x11   :  { %951 = vset.pattern.permute.xlu1 %v983_v11  ;;  %950 = vset.pattern.permute.xlu0 %v983_v11  ;;  %v989_v35 = vmov 67  }
  0x12   :  { %v110_v48 = vrot.slane %v39_v41, %v109_v40 }
  0x14   :  { %128 = vrot.lane.b32.xlu1 %v1023_v8, %s980_s2  ;;  %331 = vrot.lane.b32.xlu0 %v1023_v8, %s981_s16 }
  0x18   :  { %130 = vrot.lane.b32.xlu1 %v1030_v9, %s980_s2  ;;  %333 = vrot.lane.b32.xlu0 %v1030_v9, %s981_s16 }
  0x1c   :  { %132 = vrot.lane.b32.xlu1 %v1037_v10, %s980_s2  ;;  %437 = vrot.lane.b32.xlu0 %v1016_v7, %s982_s23 }
  0x20   :  { %335 = vrot.lane.b32.xlu1 %v1037_v10, %s981_s16  ;;  %441 = vrot.lane.b32.xlu0 %v1030_v9, %s982_s23 }
  0x24   :  { %439 = vrot.lane.b32.xlu1 %v1023_v8, %s982_s23  ;;  %546 = vperm.xlu0 %950, %v1016_v7  }
  0x28   :  { %443 = vrot.lane.b32.xlu1 %v1037_v10, %s982_s23  ;;  %558 = vperm.xlu0 %950, %v1037_v10  }
  0x2c   :  { %550 = vperm.xlu1 %951, %v1023_v8   ;;  %603 = vrot.lane.b32.xlu0 %v1023_v8, %s984_s1 }
  0x2d   :  { %953 = vset.pattern.permute.xlu0 %v987_v33 }
  0x30   :  { %554 = vperm.xlu1 %951, %v1030_v9   ;;  %607 = vrot.lane.b32.xlu0 %v1037_v10, %s984_s1 }
  0x34   :  { %601 = vrot.lane.b32.xlu1 %v1016_v7, %s984_s1  ;;  %590 = vperm.xlu0 %953, %v1023_v8  }
  0x35   :  { %952 = vset.pattern.permute.xlu1 %v987_v33 }
  0x38   :  { %605 = vrot.lane.b32.xlu1 %v1030_v9, %s984_s1 }
  0x3c   :  { %586 = vperm.xlu1 %952, %v1016_v7  }
  0x40   :  { %594 = vperm.xlu1 %952, %v1030_v9  }
  0x44   :  { %598 = vperm.xlu1 %952, %v1037_v10  }
  0x81   :  { %v86_v36 = vpop.permute.xlu1 %85  ;;  %v67_v37 = vpop.permute.xlu0 %66 }
  0x82   :  { %v92_v39 = vmul.f32 %v91_v34, %v86_v36  ;;  %v73_v42 = vmul.f32 %v72_v38, %v67_v37  ;;  %v988_v34 = vmov 66  }
  0x83   :  { %954 = vset.pattern.permute.xlu0 %v988_v34  ;;  %955 = vset.pattern.permute.xlu1 %v988_v34 }
  0x84   :  { %739 = vperm.xlu0 %954, %v1016_v7   ;;  %743 = vperm.xlu1 %955, %v1023_v8  }
  0x86   :  { %v95_v43 = vpop.permute.xlu1 %94  ;;  %v76_v44 = vpop.permute.xlu0 %75 }
  0x87   :  { %v97_v45 = vadd.f32 %v95_v43, %v92_v39  ;;  %v78_v46 = vadd.f32 %v76_v44, %v73_v42 }
  0x88   :  { %751 = vperm.xlu0 %954, %v1037_v10   ;;  %747 = vperm.xlu1 %955, %v1030_v9  }
  0x89   :  { %v99_v49 = vmul.f32 0.70710677, %v97_v45  ;;  %v80_v50 = vmul.f32 0.70710677, %v78_v46  ;;  %v79_v4 = vmul.f32 0.5, %v78_v46  ;;  %v98_v13 = vmul.f32 0.5, %v97_v45 }
  0x8b   :  { %958 = verf.f32 %v99_v49  ;;  %v105_v51 = vpop.permute.xlu1 %104  ;;  %v114_v52 = vpop.permute.xlu0 %113 }
  0x8c   :  { %960 = verf.f32 %v80_v50  ;;  %v111_v54 = vmul.f32 %v110_v48, %v105_v51  ;;  %957 = vset.pattern.permute.xlu0 %v989_v35  ;;  %956 = vset.pattern.permute.xlu1 %v989_v35 }
  0x8d   :  { %763 = vperm.xlu0 %957, %v1023_v8   ;;  %759 = vperm.xlu1 %956, %v1016_v7  }
  0x8e   :  { %v116_v55 = vadd.f32 %v114_v52, %v111_v54 }
  0x8f   :  { %v127_v56 = vpop.permute.xlu1 %126  ;;  %v330_v57 = vpop.permute.xlu0 %329 }
  0x90   :  { %v118_v60 = vmul.f32 0.70710677, %v116_v55  ;;  %852 = vmatprep.mubr.msk.f32.mxu0 %vm134_vm0, %v127_v56  ;;  %v117_v19 = vmul.f32 0.5, %v116_v55 }
  0x91   :  { %767 = vperm.xlu1 %956, %v1030_v9  }
  0x92   :  { %962 = verf.f32 %v118_v60 }
  0x93   :  { %v129_v61 = vpop.permute.xlu1 %128  ;;  %v332_v1 = vpop.permute.xlu0 %331 }
  0x95   :  { %v959_v0 = vpop.eup %958  ;;  %771 = vperm.xlu1 %956, %v1037_v10  }
  0x96   :  { %v961_v2 = vpop.eup %960  ;;  %v101_v11 = vadd.f32 1.0, %v959_v0 }
  0x97   :  { %v82_v5 = vadd.f32 1.0, %v961_v2  ;;  %v131_v6 = vpop.permute.xlu1 %130  ;;  %v334_v16 = vpop.permute.xlu0 %333 }
  0x98   :  { %855 = vmatprep.mubr.msk.f32.mxu1 %vm134_vm0, %v131_v6  ;;  %v102_v18 = vmul.f32 %v101_v11, %v98_v13 }
  0x99   :  { %v83_v12 = vmul.f32 %v82_v5, %v79_v4 }
  0x9b   :  { %850 = vmatprep.subr.msk.mxu0 %vm143_vm3, %v83_v12  ;;  %912 = vmatprep.subr.msk.mxu1 %vm143_vm3, %v83_v12  ;;  %v133_v15 = vpop.permute.xlu1 %132  ;;  %v438_v26 = vpop.permute.xlu0 %437 }
  0x9c   :  { %v963_v17 = vpop.eup %962  ;;  %851 = vmatpush3.msk.msra.mxu0 %vm143_vm3, %v83_v12  ;;  %913 = vmatpush3.msk.msra.mxu1 %vm143_vm3, %v83_v12 }
  0x9d   :  { %v120_v20 = vadd.f32 1.0, %v963_v17  ;;  %853 = vmatmul.mubr.msk.f32.vlgmr.msra.gmra.mrb[0].mxu0 %vm134_vm0, %v129_v61  ;;  %901 = vmatprep.subr.msk.bf16.mxu1 %vm1058_vm4, %v985_v21 }
  0x9e   :  { %870 = vmatprep.subr.msk.mxu0 %vm143_vm3, %v102_v18  ;;  %856 = vmatmul.mubr.msk.f32.vlgmr.msra.gmra.mrb[0].mxu1 %vm134_vm0, %v133_v15 }
  0x9f   :  { %v121_v24 = vmul.f32 %v120_v20, %v117_v19  ;;  %903 = vmatpush3.bf16.msk.msra.mxu1 %vm1058_vm4, %v985_v21  ;;  %871 = vmatpush3.msk.msra.mxu0 %vm143_vm3, %v102_v18  ;;  %v336_v25 = vpop.permute.xlu1 %335  ;;  %v442_v28 = vpop.permute.xlu0 %441 }
  0xa0   :  { %872 = vmatprep.mubr.msk.f32.mxu0 %vm134_vm0, %v330_v57  ;;  %862 = vmatprep.subr.msk.mxu1 %vm143_vm3, %v793_v23 }
  0xa1   :  { %873 = vmatmul.mubr.msk.f32.vlgmr.msra.gmra.mrb[2].mxu0 %vm134_vm0, %v332_v1  ;;  %864 = vmatprep.mubr.msk.f32.mxu1 %vm232_vm6, %v1016_v7 }
  0xa2   :  { %878 = vmatprep.subr.msk.mxu0 %vm143_vm3, %v121_v24  ;;  %875 = vmatprep.mubr.msk.f32.mxu0 %vm134_vm0, %v334_v16 }
  0xa3   :  { %863 = vmatpush3.msk.msra.mxu1 %vm143_vm3, %v793_v23  ;;  %879 = vmatpush3.msk.msra.mxu0 %vm143_vm3, %v121_v24  ;;  %v440_v27 = vpop.permute.xlu1 %439  ;;  %v547_v43 = vpop.permute.xlu0 %546 }
  0xa4   :  { %865 = vmatmul.mubr.msk.f32.vlgmr.msra.gmra.mrb[2].mxu1 %vm232_vm6, %v1023_v8 }
  0xa5   :  { %876 = vmatmul.mubr.msk.f32.gmra.mrb[4].mxu0 %vm134_vm0, %v336_v25  ;;  %867 = vmatprep.mubr.msk.f32.mxu1 %vm232_vm6, %v1030_v9 }
  0xa6   :  { %880 = vmatprep.mubr.msk.f32.mxu0 %vm134_vm0, %v438_v26 }
  0xa7   :  { %v444_v29 = vpop.permute.xlu1 %443  ;;  %v559_v52 = vpop.permute.xlu0 %558 }
  0xa8   :  { %868 = vmatmul.mubr.msk.f32.gmra.mrb[0].mxu1 %vm232_vm6, %v1037_v10 }
  0xa9   :  { %881 = vmatmul.mubr.msk.f32.vlgmr.msra.gmra.mrb[2].mxu0 %vm134_vm0, %v440_v27 }
  0xaa   :  { %883 = vmatprep.mubr.msk.f32.mxu0 %vm134_vm0, %v442_v28 }
  0xab   :  { %v551_v30 = vpop.permute.xlu1 %550  ;;  %v604_v16 = vpop.permute.xlu0 %603 }
  0xad   :  { %884 = vmatmul.mubr.msk.f32.gmra.mrb[4].mxu0 %vm134_vm0, %v444_v29 }
  0xaf   :  { %v555_v31 = vpop.permute.xlu1 %554  ;;  %v608_v18 = vpop.permute.xlu0 %607 }
  0xb3   :  { %v602_v32 = vpop.permute.xlu1 %601  ;;  %v591_v20 = vpop.permute.xlu0 %590 }
  0xb4   :  { %894 = vmatprep.mubr.msk.f32.mxu1 %vm609_vm7, %v602_v32 }
  0xb7   :  { %v606_v17 = vpop.permute.xlu1 %605 }
  0xbb   :  { %v587_v19 = vpop.permute.xlu1 %586 }
  0xbf   :  { %v595_v22 = vpop.permute.xlu1 %594 }
 0x170   :  { %v854_v36 = vpop.f32.mrb[0].mxu0 }
 0x171   :  { %v213_v37 = vpop.f32.mrb[1].mxu0 }
 0x177   :  { %v866_v38 = vpop.f32.mrb[2].mxu1 }
 0x178   :  { %v316_v39 = vadd.f32 %v866_v38, %v854_v36  ;;  %v310_v40 = vpop.f32.mrb[3].mxu1 }
 0x179   :  { %v311_v41 = vadd.f32 %v310_v40, %v213_v37 }
 0x17b   :  { %v869_v42 = vpop.f32.mrb[0].mxu1 }
 0x17c   :  { %v320_v44 = vpop.f32.mrb[1].mxu1  ;;  %v882_v45 = vpop.f32.mrb[2].mxu0 }
 0x17d   :  { %v915_v8 = vadd.f32 %v882_v45, %v316_v39  ;;  %v522_v46 = vpop.f32.mrb[3].mxu0 }
 0x17e   :  { %v917_v47 = vadd.f32 %v522_v46, %v311_v41 }
 0x17f   :  { %v562_v48 = vadd.f32 %v915_v8, %v551_v30  ;;  %v599_v30 = vpop.permute.xlu1 %598 }
 0x180   :  { %v561_v49 = vadd.f32 %v917_v47, %v547_v43  ;;  %v885_v7 = vpop.f32.mrb[4].mxu0 }
 0x181   :  { %v570_v50 = vmul.f32 0.70710677, %v562_v48  ;;  %v918_v9 = vadd.f32 %v885_v7, %v869_v42  ;;  %v532_v51 = vpop.f32.mrb[5].mxu0  ;;  %v566_v60 = vmul.f32 0.5, %v562_v48 }
 0x182   :  { %v569_v10 = vmul.f32 0.70710677, %v561_v49  ;;  %v919_v53 = vadd.f32 %v532_v51, %v320_v44  ;;  %v565_v62 = vmul.f32 0.5, %v561_v49 }
 0x183   :  { %964 = verf.f32 %v570_v50  ;;  %v564_v54 = vadd.f32 %v918_v9, %v559_v52 }
 0x184   :  { %966 = verf.f32 %v569_v10  ;;  %v563_v55 = vadd.f32 %v919_v53, %v555_v31  ;;  %v744_v10 = vpop.permute.xlu1 %743 }
 0x185   :  { %v572_v56 = vmul.f32 0.70710677, %v564_v54  ;;  %v568_v4 = vmul.f32 0.5, %v564_v54 }
 0x186   :  { %v571_v57 = vmul.f32 0.70710677, %v563_v55  ;;  %v567_v6 = vmul.f32 0.5, %v563_v55 }
 0x187   :  { %968 = verf.f32 %v572_v56 }
 0x188   :  { %970 = verf.f32 %v571_v57  ;;  %v748_v56 = vpop.permute.xlu1 %747 }
 0x18d   :  { %v965_v58 = vpop.eup %964 }
 0x18e   :  { %v967_v59 = vpop.eup %966  ;;  %v578_v61 = vadd.f32 1.0, %v965_v58  ;;  %v760_v58 = vpop.permute.xlu1 %759 }
 0x18f   :  { %v577_v63 = vadd.f32 1.0, %v967_v59  ;;  %v740_v59 = vpop.permute.xlu0 %739 }
 0x190   :  { %v582_v0 = vmul.f32 %v578_v61, %v566_v60 }
 0x191   :  { %v969_v1 = vpop.eup %968  ;;  %v581_v2 = vmul.f32 %v577_v63, %v565_v62 }
 0x192   :  { %v971_v3 = vpop.eup %970  ;;  %v580_v5 = vadd.f32 1.0, %v969_v1  ;;  %v768_v60 = vpop.permute.xlu1 %767 }
 0x193   :  { %v579_v11 = vadd.f32 1.0, %v971_v3  ;;  %v904_v12 = vpack.c.bf16 %v582_v0, %v581_v2  ;;  %v752_v61 = vpop.permute.xlu0 %751 }
 0x194   :  { %v584_v13 = vmul.f32 %v580_v5, %v568_v4 }
 0x195   :  { %905 = vmatprep.subr.bf16.mxu1 %v904_v12  ;;  %v583_v14 = vmul.f32 %v579_v11, %v567_v6 }
 0x196   :  { %907 = vmatpush3.bf16.msra.mxu1 %v904_v12  ;;  %v772_v12 = vpop.permute.xlu1 %771 }
 0x197   :  { %v908_v15 = vpack.c.bf16 %v584_v13, %v583_v14  ;;  %v764_v3 = vpop.permute.xlu0 %763 }
 0x199   :  { %909 = vmatprep.subr.bf16.mxu1 %v908_v15 }
 0x19a   :  { %911 = vmatpush3.bf16.msra.mxu1 %v908_v15 }
 0x19d   :  { %895 = vmatmul.mubr.msk.f32.vlgmr.msra.gmra.mrb[4].mxu1 %vm609_vm7, %v604_v16 }
 0x19e   :  { %897 = vmatprep.mubr.msk.f32.mxu1 %vm609_vm7, %v606_v17 }
 0x1a1   :  { %898 = vmatmul.mubr.msk.f32.gmra.mrb[6].mxu1 %vm609_vm7, %v608_v18 }
 0x270   :  { %v896_v21 = vpop.f32.mrb[4].mxu1 }
 0x271   :  { %v690_v23 = vadd.f32 %v896_v21, %v591_v20  ;;  %v684_v24 = vpop.f32.mrb[5].mxu1 }
 0x272   :  { %v685_v25 = vadd.f32 %v684_v24, %v587_v19 }
 0x274   :  { %v703_v26 = vadd.f32 %v690_v23, %v685_v25  ;;  %v899_v27 = vpop.f32.mrb[6].mxu1 }
 0x275   :  { %v694_v28 = vpop.f32.mrb[7].mxu1  ;;  %v700_v31 = vadd.f32 %v899_v27, %v599_v30 }
 0x276   :  { %v695_v29 = vadd.f32 %v694_v28, %v595_v22 }
 0x278   :  { %v704_v32 = vadd.f32 %v703_v26, %v695_v29 }
 0x27a   :  { %v705_v33 = vadd.f32 %v704_v32, %v700_v31 }
 0x27c   :  { %v706_v34 = vrot.slane %v705_v33, 4 }
 0x27e   :  { %v707_v35 = vadd.f32 %v706_v34, %v705_v33 }
 0x280   :  { %v708_v36 = vrot.slane %v707_v35, 2 }
 0x282   :  { %v709_v37 = vadd.f32 %v708_v36, %v707_v35 }
 0x284   :  { %v710_v38 = vrot.slane %v709_v37, 1 }
 0x286   :  { %v711_v39 = vadd.f32 %v710_v38, %v709_v37 }
 0x288   :  { %v713_v40 = vmul.f32 0.03125, %v711_v39 }
 0x28a   :  { %v716_v41 = vsub.f32 %v695_v29, %v713_v40  ;;  %v717_v42 = vsub.f32 %v700_v31, %v713_v40  ;;  %v714_v43 = vsub.f32 %v685_v25, %v713_v40  ;;  %v715_v44 = vsub.f32 %v690_v23, %v713_v40 }
 0x28c   :  { %v718_v45 = vmul.f32 %v714_v43, %v714_v43  ;;  %v719_v8 = vmul.f32 %v715_v44, %v715_v44  ;;  %v720_v46 = vmul.f32 %v716_v41, %v716_v41  ;;  %v721_v48 = vmul.f32 %v717_v42, %v717_v42 }
 0x28e   :  { %v722_v47 = vadd.f32 %v719_v8, %v718_v45 }
 0x290   :  { %v723_v49 = vadd.f32 %v722_v47, %v720_v46 }
 0x292   :  { %v724_v7 = vadd.f32 %v723_v49, %v721_v48 }
 0x294   :  { %v725_v50 = vrot.slane %v724_v7, 4 }
 0x296   :  { %v726_v9 = vadd.f32 %v725_v50, %v724_v7 }
 0x298   :  { %v727_v51 = vrot.slane %v726_v9, 2 }
 0x29a   :  { %v728_v52 = vadd.f32 %v727_v51, %v726_v9 }
 0x29c   :  { %v729_v53 = vrot.slane %v728_v52, 1 }
 0x29e   :  { %v730_v54 = vadd.f32 %v729_v53, %v728_v52 }
 0x2a0   :  { %v731_v55 = vmul.f32 0.03125, %v730_v54 }
 0x2a2   :  { %v732_v57 = vadd.f32 1e-05, %v731_v55 }
 0x2a4   :  { %972 = vrsqrt.f32 %v732_v57 }
 0x2ae   :  { %v973_v62 = vpop.eup %972 }
 0x2af   :  { %v735_v63 = vmul.f32 %v973_v62, %v715_v44  ;;  %v736_v0 = vmul.f32 %v973_v62, %v716_v41  ;;  %v734_v1 = vmul.f32 %v973_v62, %v714_v43  ;;  %v737_v2 = vmul.f32 %v973_v62, %v717_v42 }
 0x2b1   :  { %v755_v4 = vmul.f32 %v744_v10, %v735_v63  ;;  %v756_v5 = vmul.f32 %v748_v56, %v736_v0  ;;  %v754_v6 = vmul.f32 %v740_v59, %v734_v1  ;;  %v757_v11 = vmul.f32 %v752_v61, %v737_v2 }
 0x2b3   :  { %v774_v13 = vadd.f32 %v760_v58, %v754_v6  ;;  %v776_v14 = vadd.f32 %v768_v60, %v756_v5  ;;  %v777_v15 = vadd.f32 %v772_v12, %v757_v11  ;;  %v775_v16 = vadd.f32 %v764_v3, %v755_v4 }
 0x2b5   :  { %778 = vst [vmem:[%s1125_s3] sm:$0xff] %v774_v13  ;;  %780 = vst [vmem:[%s1125_s3 + $0x10] sm:$0xff] %v776_v14 }
 0x2b6   :  { %781 = vst [vmem:[%s1125_s3 + $0x18] sm:$0xff] %v777_v15  ;;  %779 = vst [vmem:[%s1125_s3 + $0x8] sm:$0xff] %v775_v16 }

</bundles_post_ra>
